<compile_context>
chip_gen: v5e
topology: v5e:2x2
jax: 0.10.0
libtpu: 0.0.40
codegen_flags: <defaults>
</compile_context>

<pallas_src>
import jax
import jax.numpy as jnp
from jax import lax
from jax.experimental import pallas as pl
from jax.experimental.pallas import tpu as pltpu

# >= v5e scoped default (16 MiB), <= v7x physical VMEM (64 MiB)
_VMEM_LIMIT_BYTES = 32 * 1024 * 1024


# --------------------------------------------------------------------------------------
# Tiling helpers
# --------------------------------------------------------------------------------------
def _tile_and_pad(dim, cap, align):
    """Pick a tile for `dim`: full dim if small, else the largest align-granular divisor
    <= cap; if none exists, return (cap-aligned tile, padded dim) -- the caller zero-pads
    instead of silently taking the whole dimension as one block."""
    if dim <= cap:
        return dim, dim
    t = (cap // align) * align
    while t >= align:
        if dim % t == 0:
            return t, dim
        t -= align
    t = (cap // align) * align
    padded = ((dim + t - 1) // t) * t
    return t, padded


def _choose_time_chunk(S, B, H, *, budget_bytes=8 * 1024 * 1024, max_chunk=32):
    """Timesteps per recurrence grid step, sized from a VMEM budget (gx + out chunks,
    f32, double-buffered).  Prefers a divisor of S with an 8-sublane-aligned row block
    (no padding); otherwise pads S (padded steps are discarded at the very end)."""
    per_t = max(1, B * 5 * H * 4 * 2)             # (4H gx + H out) * f32 * double-buffer
    cap = int(max(1, min(max_chunk, budget_bytes // per_t, S)))
    for t in range(cap, 0, -1):
        if S % t == 0 and (t * B) % 8 == 0 and (t >= max(1, cap // 2) or t == S):
            return t, S
    if S <= cap:                                   # whole sequence in one (full-dim) chunk
        return S, S
    t = cap
    while t > 1 and (t * B) % 8 != 0:
        t -= 1
    if (t * B) % 8 != 0:
        t = 8
    S_pad = ((S + t - 1) // t) * t
    return t, S_pad


# --------------------------------------------------------------------------------------
# Fused (modality-batched) linear kernel: topic_fc + hoisted gate projections
# --------------------------------------------------------------------------------------
def fused_linear_kernel(x_ref, w_ref, b_ref, o_ref, acc_ref):
    # x: (tm, tk), w: (tk, tn) pre-transposed, b: (1, tn), o: (tm, tn)
    # grid = (M, R/tm, N/tn, K/tk); K innermost for the accumulator protocol.
    @pl.when(pl.program_id(3) == 0)
    def _():
        acc_ref[...] = jnp.zeros_like(acc_ref)

    acc_ref[...] += jnp.dot(x_ref[...], w_ref[...], preferred_element_type=jnp.float32)

    @pl.when(pl.program_id(3) == pl.num_programs(3) - 1)
    def _():
        o_ref[...] = (acc_ref[...] + b_ref[...].astype(jnp.float32)).astype(o_ref.dtype)


def fused_linear(x, w_t, b, *, bf16_matmul=False):
    """y[m] = x[m] @ w_t[m] + b[m] for all modalities in one pallas_call.

    x: (M, R, K), w_t: (M, K, N) pre-transposed, b: (M, N)  ->  (M, R, N)."""
    M, R, K = x.shape
    N = w_t.shape[2]
    out_dtype = x.dtype

    tm, Rp = _tile_and_pad(R, 512, 8)
    tn, Np = _tile_and_pad(N, 512, 128)
    tk, Kp = _tile_and_pad(K, 512, 128)
    if Rp != R:
        x = jnp.pad(x, ((0, 0), (0, Rp - R), (0, 0)))
    if Kp != K:                                    # zero K-padding is mathematically exact
        x = jnp.pad(x, ((0, 0), (0, 0), (0, Kp - K)))
        w_t = jnp.pad(w_t, ((0, 0), (0, Kp - K), (0, 0)))
    if Np != N:
        w_t = jnp.pad(w_t, ((0, 0), (0, 0), (0, Np - N)))
        b = jnp.pad(b, ((0, 0), (0, Np - N)))

    if bf16_matmul:
        # TODO(synk): enable on v6e/v7x; relax the demo 1e-4 tolerance when this lands.
        x = x.astype(jnp.bfloat16)
        w_t = w_t.astype(jnp.bfloat16)

    grid = (M, Rp // tm, Np // tn, Kp // tk)
    out = pl.pallas_call(
        fused_linear_kernel,
        out_shape=jax.ShapeDtypeStruct((M, Rp, Np), out_dtype),
        grid_spec=pltpu.PrefetchScalarGridSpec(
            num_scalar_prefetch=0,
            grid=grid,
            in_specs=[
                pl.BlockSpec((None, tm, tk), lambda m, i, j, k: (m, i, k)),
                pl.BlockSpec((None, tk, tn), lambda m, i, j, k: (m, k, j)),
                pl.BlockSpec((None, 1, tn), lambda m, i, j, k: (m, 0, j)),
            ],
            out_specs=pl.BlockSpec((None, tm, tn), lambda m, i, j, k: (m, i, j)),
            scratch_shapes=[pltpu.VMEM((tm, tn), jnp.float32)],
        ),
        compiler_params=pltpu.CompilerParams(
            dimension_semantics=("parallel", "parallel", "parallel", "arbitrary"),
            vmem_limit_bytes=_VMEM_LIMIT_BYTES),
    )(x, w_t, b.reshape(M, 1, Np))
    if Rp != R or Np != N:
        out = out[:, :R, :N]
    return out


# --------------------------------------------------------------------------------------
# LSTM recurrence kernel: modality = leading "parallel" grid axis, time = inner axis
# --------------------------------------------------------------------------------------
def lstm_recurrence_kernel(gx_ref, whh_ref, o_ref, h_ref, c_ref):
    # gx_ref : (Tt*B, 4H)  precomputed x @ W_ih^T + (b_ih + b_hh), rows time-major
    # whh_ref: (H, 4H)     pre-transposed hidden weights for this modality
    # o_ref  : (Tt*B, H)   hidden-state outputs for this time chunk
    # h_ref/c_ref: (B, H)  f32 VMEM scratch carried across the (sequential) time axis
    @pl.when(pl.program_id(1) == 0)      # start of each modality -> reset state
    def _():
        h_ref[...] = jnp.zeros_like(h_ref)
        c_ref[...] = jnp.zeros_like(c_ref)

    B, H = h_ref.shape
    G = 4 * H
    Tt = gx_ref.shape[0] // B
    whh = whh_ref[...]                   # hoisted out of the time loop, reused every step

    # torch gate order is [i, f, g, o].  i/f/o use sigmoid(x) = 0.5*tanh(0.5*x) + 0.5
    # (single EUP op), g uses tanh: one full-width tanh over (B, 4H) per step with
    # per-gate constant scale/shift (hoisted), no per-gate slicing before activation.
    gate_idx = lax.broadcasted_iota(jnp.int32, (1, G), 1) // H
    is_g = gate_idx == 2
    pre = jnp.where(is_g, jnp.float32(1.0), jnp.float32(0.5))
    post_shift = jnp.where(is_g, jnp.float32(0.0), jnp.float32(0.5))

    def step(t, carry):
        r = pl.multiple_of(t * B, B)
        gates = gx_ref[pl.ds(r, B), :].astype(jnp.float32) + jnp.dot(
            h_ref[...], whh, preferred_element_type=jnp.float32)     # (B, 4H)
        act = pre * jnp.tanh(pre * gates) + post_shift
        i_g = act[:, 0 * H:1 * H]
        f_g = act[:, 1 * H:2 * H]
        g_g = act[:, 2 * H:3 * H]
        o_g = act[:, 3 * H:4 * H]
        c_new = f_g * c_ref[...] + i_g * g_g
        h_new = o_g * jnp.tanh(c_new)
        c_ref[...] = c_new
        h_ref[...] = h_new
        o_ref[pl.ds(r, B), :] = h_new.astype(o_ref.dtype)
        return carry

    lax.fori_loop(0, Tt, step, 0, unroll=True)


def lstm_recurrence(gx, whh_t, B, *, time_chunk):
    """gx: (M, S_pad*B, 4H), whh_t: (M, H, 4H) -> (M, S_pad*B, H). Zero initial h/c."""
    M, R, G = gx.shape
    H = whh_t.shape[1]
    S_pad = R // B
    Tt = time_chunk
    assert S_pad % Tt == 0
    return pl.pallas_call(
        lstm_recurrence_kernel,
        out_shape=jax.ShapeDtypeStruct((M, R, H), gx.dtype),
        grid_spec=pltpu.PrefetchScalarGridSpec(
            num_scalar_prefetch=0,
            # Modality outer ("parallel" -> maps to the 2nd TensorCore on v7x megacore,
            # plain outer loop on v5e/v6e); time inner & sequential ("arbitrary").
            grid=(M, S_pad // Tt),
            in_specs=[
                pl.BlockSpec((None, Tt * B, G), lambda m, c: (m, c, 0)),
                # Constant block index along the time axis: only (H, 4H) per buffer.
                pl.BlockSpec((None, H, G), lambda m, c: (m, 0, 0)),
            ],
            out_specs=pl.BlockSpec((None, Tt * B, H), lambda m, c: (m, c, 0)),
            scratch_shapes=[
                pltpu.VMEM((B, H), jnp.float32),   # h (per-core instance on megacore)
                pltpu.VMEM((B, H), jnp.float32),   # c
            ],
        ),
        compiler_params=pltpu.CompilerParams(
            dimension_semantics=("parallel", "arbitrary"),
            vmem_limit_bytes=_VMEM_LIMIT_BYTES),
    )(gx, whh_t)


def lstm_stack(xs, params_list, *, bf16_matmul=False):
    """Multi-layer LSTM stacks for M modalities, fused across modalities per layer.

    xs:          per-modality inputs, each (S, B, I_m); S and B shared.
    params_list: per-modality list over layers of (w_ih, w_hh, b_ih, b_hh) in torch layout.
    Returns:     per-modality outputs, each (S, B, H)."""
    M = len(xs)
    S, B, _ = xs[0].shape
    num_layers = len(params_list[0])
    H = params_list[0][0][1].shape[1]

    Tt, S_pad = _choose_time_chunk(S, B, H)

    # One stack at entry; activations stay in the fused (M, S_pad*B, .) layout after this.
    I_max = max(int(x.shape[-1]) for x in xs)
    padded = [jnp.pad(x, ((0, 0), (0, 0), (0, I_max - x.shape[-1])))
              if x.shape[-1] < I_max else x for x in xs]
    x_fused = jnp.stack(padded, axis=0)                         # (M, S, B, I_max)
    if S_pad != S:
        x_fused = jnp.pad(x_fused, ((0, 0), (0, S_pad - S), (0, 0), (0, 0)))
    cur = x_fused.reshape(M, S_pad * B, I_max)                  # rows time-major: r = s*B + b

    for layer in range(num_layers):
        in_dim = cur.shape[-1]
        w_ih_l, w_hh_l, b_l = [], [], []
        for m in range(M):
            w_ih, w_hh, b_ih, b_hh = params_list[m][layer]
            w_ih_t = w_ih.T                                     # (I_m, 4H), pre-transposed
            if w_ih_t.shape[0] < in_dim:                        # zero rows for padded features
                w_ih_t = jnp.pad(w_ih_t, ((0, in_dim - w_ih_t.shape[0]), (0, 0)))
            w_ih_l.append(w_ih_t)
            w_hh_l.append(w_hh.T)                               # (H, 4H)
            b_l.append(b_ih + b_hh)
        w_ih_f = jnp.stack(w_ih_l, axis=0)                      # weights only (small)
        w_hh_f = jnp.stack(w_hh_l, axis=0)
        b_f = jnp.stack(b_l, axis=0)

        # Hoisted gate projection over all timesteps -> recurrence, all in fused layout.
        gx = fused_linear(cur, w_ih_f, b_f, bf16_matmul=bf16_matmul)   # (M, S_pad*B, 4H)
        cur = lstm_recurrence(gx, w_hh_f, B, time_chunk=Tt)            # (M, S_pad*B, H)
        # Inter-layer dropout: rate 0.0 / eval -> identity (omitted).

    out = cur.reshape(M, S_pad, B, H)[:, :S]                    # single slice at the very end
    return [out[m] for m in range(M)]


# --------------------------------------------------------------------------------------
# MultiModalEncoder forward
# --------------------------------------------------------------------------------------
def multimodal_encoder_forward(encoder_batch, params, *, bf16_matmul=False):
    x_topic = encoder_batch["topic"]   # (S, B, topic_in)
    x_image = encoder_batch["image"]   # (S, B, image_in)
    x_text = encoder_batch["text"]     # (S, B, text_in)

    S, B, Dt = x_topic.shape
    w_topic, b_topic = params["topic_fc"]
    H = w_topic.shape[0]

    # topic_fc(x_topic).unsqueeze(0) -> (1, S, B, H)
    out_topic = fused_linear(
        x_topic.reshape(1, S * B, Dt), w_topic.T[None], b_topic[None],
        bf16_matmul=bf16_matmul).reshape(1, S, B, H)

    img_params, txt_params = params["image"], params["text"]
    if len(img_params) == len(txt_params):
        # Fused path: both modality stacks share one pallas_call sequence per layer.
        out_image, out_text = lstm_stack(
            [x_image, x_text], [img_params, txt_params], bf16_matmul=bf16_matmul)
    else:
        (out_image,) = lstm_stack([x_image], [img_params], bf16_matmul=bf16_matmul)
        (out_text,) = lstm_stack([x_text], [txt_params], bf16_matmul=bf16_matmul)
    return out_topic, out_image, out_text


# --------------------------------------------------------------------------------------
# Parameter construction (deterministic, mimics init_weights shapes)
# --------------------------------------------------------------------------------------
def xavier_normal(key, shape):
    fan_out, fan_in = shape
    std = (2.0 / (fan_in + fan_out)) ** 0.5
    return std * jax.random.normal(key, shape, dtype=jnp.float32)


def orthogonal(key, shape):
    rows, cols = shape
    n = max(rows, cols)
    a = jax.random.normal(key, (n, n), dtype=jnp.float32)
    q, _ = jnp.linalg.qr(a)
    return q[:rows, :cols]


def make_lstm_params(key, input_dim, hidden_dim, num_layers):
    params = []
    for layer in range(num_layers):
        k = jax.random.fold_in(key, layer)
        k1, k2, k3, k4 = jax.random.split(k, 4)
        in_dim = input_dim if layer == 0 else hidden_dim
        if layer == 0:
            # matches init_weights(): xavier_normal_ on weight_ih_l0, orthogonal_ on weight_hh_l0
            w_ih = xavier_normal(k1, (4 * hidden_dim, in_dim))
            w_hh = orthogonal(k2, (4 * hidden_dim, hidden_dim))
        else:
            bound = 1.0 / (hidden_dim ** 0.5)
            w_ih = jax.random.uniform(k1, (4 * hidden_dim, in_dim), jnp.float32, -bound, bound)
            w_hh = jax.random.uniform(k2, (4 * hidden_dim, hidden_dim), jnp.float32, -bound, bound)
        bound = 1.0 / (hidden_dim ** 0.5)
        b_ih = jax.random.uniform(k3, (4 * hidden_dim,), jnp.float32, -bound, bound)
        b_hh = jax.random.uniform(k4, (4 * hidden_dim,), jnp.float32, -bound, bound)
        params.append((w_ih, w_hh, b_ih, b_hh))
    return params


# --------------------------------------------------------------------------------------
# Pure-JAX reference (for correctness check)
# --------------------------------------------------------------------------------------
def lstm_layer_ref(x, w_ih, w_hh, b_ih, b_hh):
    H = w_hh.shape[1]
    B = x.shape[1]

    def step(carry, x_t):
        h, c = carry
        g = x_t @ w_ih.T + b_ih + h @ w_hh.T + b_hh
        i = jax.nn.sigmoid(g[:, 0 * H:1 * H])
        f = jax.nn.sigmoid(g[:, 1 * H:2 * H])
        gg = jnp.tanh(g[:, 2 * H:3 * H])
        o = jax.nn.sigmoid(g[:, 3 * H:4 * H])
        c = f * c + i * gg
        h = o * jnp.tanh(c)
        return (h, c), h

    init = (jnp.zeros((B, H), jnp.float32), jnp.zeros((B, H), jnp.float32))
    _, ys = lax.scan(step, init, x)
    return ys


def forward_ref(encoder_batch, params):
    x_topic = encoder_batch["topic"]
    S, B, Dt = x_topic.shape
    w, b = params["topic_fc"]
    out_topic = (x_topic.reshape(S * B, Dt) @ w.T + b).reshape(1, S, B, w.shape[0])
    out_image = encoder_batch["image"]
    for p in params["image"]:
        out_image = lstm_layer_ref(out_image, *p)
    out_text = encoder_batch["text"]
    for p in params["text"]:
        out_text = lstm_layer_ref(out_text, *p)
    return out_topic, out_image, out_text


# --------------------------------------------------------------------------------------
if __name__ == "__main__":
    # Small config consistent with the module
    seq_len, batch = 8, 2
    topic_in, image_in, text_in, hidden = 16, 16, 16, 32
    image_layers, text_layers = 2, 2

    key = jax.random.PRNGKey(0)
    k_data, k_topic, k_img, k_txt = jax.random.split(key, 4)
    kd1, kd2, kd3 = jax.random.split(k_data, 3)

    encoder_batch = {
        "topic": jax.random.normal(kd1, (seq_len, batch, topic_in), jnp.float32),
        "image": jax.random.normal(kd2, (seq_len, batch, image_in), jnp.float32),
        "text": jax.random.normal(kd3, (seq_len, batch, text_in), jnp.float32),
    }

    kt1, kt2 = jax.random.split(k_topic)
    params = {
        "topic_fc": (
            xavier_normal(kt1, (hidden, topic_in)),
            jax.random.uniform(kt2, (hidden,), jnp.float32,
                               -1.0 / topic_in ** 0.5, 1.0 / topic_in ** 0.5),
        ),
        "image": make_lstm_params(k_img, image_in, hidden, image_layers),
        "text": make_lstm_params(k_txt, text_in, hidden, text_layers),
    }

    out_topic, out_image, out_text = jax.block_until_ready(
        multimodal_encoder_forward(encoder_batch, params, bf16_matmul=False)
    )

    ref_topic, ref_image, ref_text = forward_ref(encoder_batch, params)

    assert out_topic.shape == (1, seq_len, batch, hidden)
    assert out_image.shape == (seq_len, batch, hidden)
    assert out_text.shape == (seq_len, batch, hidden)
    assert jnp.allclose(out_topic, ref_topic, atol=1e-4, rtol=1e-4)
    assert jnp.allclose(out_image, ref_image, atol=1e-4, rtol=1e-4)
    assert jnp.allclose(out_text, ref_text, atol=1e-4, rtol=1e-4)

    print("KERNEL_OK")
</pallas_src>

<mosaic_0001>
module attributes {stable_mosaic.version = 11 : i64} {
  func.func @fused_linear_kernel(%arg0: i32, %arg1: i32, %arg2: i32, %arg3: i32, %arg4: memref<1x16x16xf32, #tpu.memory_space<vmem>>, %arg5: memref<1x16x32xf32, #tpu.memory_space<vmem>>, %arg6: memref<1x1x32xf32, #tpu.memory_space<vmem>>, %arg7: memref<1x16x32xf32, #tpu.memory_space<vmem>>, %arg8: memref<16x32xf32, #tpu.memory_space<vmem>>) attributes {dimension_semantics = [#tpu.dimension_semantics<parallel>, #tpu.dimension_semantics<parallel>, #tpu.dimension_semantics<parallel>, #tpu.dimension_semantics<arbitrary>], iteration_bounds = array<i64: 1, 1, 1, 1>, scalar_prefetch = 0 : i64, scratch_operands = 1 : i64, tpu.core_type = #tpu.core_type<tc>, window_params = [{transform_indices = @transform_0, window_bounds = array<i64: 1, 16, 16>}, {transform_indices = @transform_1, window_bounds = array<i64: 1, 16, 32>}, {transform_indices = @transform_2, window_bounds = array<i64: 1, 1, 32>}, {transform_indices = @transform_3, window_bounds = array<i64: 1, 16, 32>}]} {
    %c0_i32 = arith.constant 0 : i32
    %0 = arith.cmpi eq, %arg3, %c0_i32 : i32
    %1 = arith.extui %0 : i1 to i32
    %c0_i32_0 = arith.constant 0 : i32
    %2 = arith.cmpi ne, %1, %c0_i32_0 : i32
    scf.if %2 {
      %cst_12 = arith.constant 0.000000e+00 : f32
      %14 = vector.broadcast %cst_12 : f32 to vector<16x32xf32>
      %c0_13 = arith.constant 0 : index
      %c0_14 = arith.constant 0 : index
      %15 = vector.load %arg8[%c0_13, %c0_14] : memref<16x32xf32, #tpu.memory_space<vmem>>, vector<16x32xf32>
      tpu.vector_store %arg8[%c0_13, %c0_14], %14 {strides = array<i32>} : memref<16x32xf32, #tpu.memory_space<vmem>>, vector<16x32xf32>,
    } else {
    }
    %c0 = arith.constant 0 : index
    %c0_1 = arith.constant 0 : index
    %3 = vector.load %arg8[%c0, %c0_1] : memref<16x32xf32, #tpu.memory_space<vmem>>, vector<16x32xf32>
    %c0_2 = arith.constant 0 : index
    %c0_3 = arith.constant 0 : index
    %c0_4 = arith.constant 0 : index
    %4 = vector.load %arg4[%c0_2, %c0_3, %c0_4] : memref<1x16x16xf32, #tpu.memory_space<vmem>>, vector<1x16x16xf32>
    %5 = vector.shape_cast %4 : vector<1x16x16xf32> to vector<16x16xf32>
    %c0_5 = arith.constant 0 : index
    %c0_6 = arith.constant 0 : index
    %c0_7 = arith.constant 0 : index
    %6 = vector.load %arg5[%c0_5, %c0_6, %c0_7] : memref<1x16x32xf32, #tpu.memory_space<vmem>>, vector<1x16x32xf32>
    %7 = vector.shape_cast %6 : vector<1x16x32xf32> to vector<16x32xf32>
    %cst = arith.constant dense<0.000000e+00> : vector<16x32xf32>
    %8 = tpu.matmul %5, %7, %cst {dimension_numbers = #tpu.dot_dimension_numbers<[1], [0], [0], [1], [0, 0, 1, 1], [], []>} : vector<16x16xf32>, vector<16x32xf32>, vector<16x32xf32> -> vector<16x32xf32>
    %9 = arith.addf %3, %8 : vector<16x32xf32>
    %c0_8 = arith.constant 0 : index
    %c0_9 = arith.constant 0 : index
    %10 = vector.load %arg8[%c0_8, %c0_9] : memref<16x32xf32, #tpu.memory_space<vmem>>, vector<16x32xf32>
    tpu.vector_store %arg8[%c0_8, %c0_9], %9 {strides = array<i32>} : memref<16x32xf32, #tpu.memory_space<vmem>>, vector<16x32xf32>,
    %c0_i32_10 = arith.constant 0 : i32
    %11 = arith.cmpi eq, %arg3, %c0_i32_10 : i32
    %12 = arith.extui %11 : i1 to i32
    %c0_i32_11 = arith.constant 0 : i32
    %13 = arith.cmpi ne, %12, %c0_i32_11 : i32
    scf.if %13 {
      %c0_12 = arith.constant 0 : index
      %c0_13 = arith.constant 0 : index
      %14 = vector.load %arg8[%c0_12, %c0_13] : memref<16x32xf32, #tpu.memory_space<vmem>>, vector<16x32xf32>
      %c0_14 = arith.constant 0 : index
      %c0_15 = arith.constant 0 : index
      %c0_16 = arith.constant 0 : index
      %15 = vector.load %arg6[%c0_14, %c0_15, %c0_16] : memref<1x1x32xf32, #tpu.memory_space<vmem>>, vector<1x1x32xf32>
      %16 = vector.shape_cast %15 : vector<1x1x32xf32> to vector<1x32xf32>
      %17 = vector.broadcast %16 : vector<1x32xf32> to vector<16x32xf32>
      %18 = arith.addf %14, %17 : vector<16x32xf32>
      %c0_17 = arith.constant 0 : index
      %c0_18 = arith.constant 0 : index
      %c0_19 = arith.constant 0 : index
      %19 = vector.load %arg7[%c0_17, %c0_18, %c0_19] : memref<1x16x32xf32, #tpu.memory_space<vmem>>, vector<1x16x32xf32>
      %20 = vector.shape_cast %19 : vector<1x16x32xf32> to vector<16x32xf32>
      %21 = vector.shape_cast %18 : vector<16x32xf32> to vector<1x16x32xf32>
      tpu.vector_store %arg7[%c0_17, %c0_18, %c0_19], %21 {strides = array<i32>} : memref<1x16x32xf32, #tpu.memory_space<vmem>>, vector<1x16x32xf32>,
    } else {
    }
    return
  }
  func.func @transform_0(%arg0: i32, %arg1: i32, %arg2: i32, %arg3: i32) -> (i32, i32, i32) {
    %c0_i32 = arith.constant 0 : i32
    return %arg0, %arg1, %arg3 : i32, i32, i32
  }
  func.func @transform_1(%arg0: i32, %arg1: i32, %arg2: i32, %arg3: i32) -> (i32, i32, i32) {
    %c0_i32 = arith.constant 0 : i32
    return %arg0, %arg3, %arg2 : i32, i32, i32
  }
  func.func @transform_2(%arg0: i32, %arg1: i32, %arg2: i32, %arg3: i32) -> (i32, i32, i32) {
    %c0_i32 = arith.constant 0 : i32
    %c0_i32_0 = arith.constant 0 : i32
    return %arg0, %c0_i32, %arg2 : i32, i32, i32
  }
  func.func @transform_3(%arg0: i32, %arg1: i32, %arg2: i32, %arg3: i32) -> (i32, i32, i32) {
    %c0_i32 = arith.constant 0 : i32
    return %arg0, %arg1, %arg2 : i32, i32, i32
  }
}

</mosaic_0001>

<bundles_post_ra>
// kernel: tpu_custom_call.1
= control target key start
LH: loop header
LB: loop body
LE: loop exit
PB: predicated region body
PF: predicated region fallthrough
CT: control target
= control target key end

     0   :  { %8 = vsyncpa [#allocation4], 0  ;;  %s270_s0 = inlined_call_operand.hbm [shape: f32[1,16,16], index: 0, kind: input, shape index: {}]   ;;  %s271_s1 = inlined_call_operand.hbm [shape: f32[1,16,32], index: 1, kind: input, shape index: {}]   ;;  %s272_s2 = inlined_call_operand.vmem [shape: f32[1,1,32], index: 2, kind: input, shape index: {}]   ;;  %s273_s3 = inlined_call_operand.hbm [shape: f32[1,16,32], index: 3, kind: output, shape index: {}]  }
   0x1   :  { %9 = vsyncpa [#allocation7], 0 }
   0x2   :  { %10 = vsyncpa [#allocation5], 0  ;;  %s15_s14 = sshll.u32 %s270_s0, 4  ;;  %s217_s15 = smov [#allocation3]   ;;  %s16_s14 = int_to_ptr.hbm [resolvable:$true] %s15_s14 }
   0x3   :  { %s17_s16 = sshll.u32 %s217_s15, 4  ;;  %s28_s19 = sshll.u32 %s271_s1, 4  ;;  %s18_s16 = int_to_ptr.vmem [resolvable:$true] %s17_s16  ;;  %s29_s19 = int_to_ptr.hbm [resolvable:$true] %s28_s19 }
   0x4   :  { %s218_s20 = smov 128   ;;  %s219_s21 = smov 8  }
   0x5   :  { %23 = dma.hbm_to_vmem [thread:$0]  %s16_s14, 256, %s18_s16, [#allocation4], %s218_s20, %s218_s20, %s219_s21  }
   0x6   :  { %s220_s22 = smov [#allocation6]  }
   0x7   :  { %s30_s23 = sshll.u32 %s220_s22, 4  ;;  %s31_s23 = int_to_ptr.vmem [resolvable:$true] %s30_s23 }
   0x8   :  { %36 = dma.hbm_to_vmem [thread:$0]  %s29_s19, 256, %s31_s23, [#allocation7], %s218_s20, %s218_s20, %s219_s21  }
   0x9   :  { %211 = dma.done.wait [#allocation4], 256  }
   0xa   :  { %212 = vsyncadd [#allocation4], 4294967040 }
   0xb   :  { %213 = dma.done.wait [#allocation7], 256  }
   0xc   :  { %214 = vsyncadd [#allocation7], 4294967040  ;;  %vm51_vm0 = vcmask 261120   ;;  %v221_v0 = vmov 0.0   ;;  %v59_v1 = vld [vmem:[#allocation6 + $0x8] sm:$0xff]  ;;  %v58_v2 = vld [vmem:[#allocation6] sm:$0xff] }
   0xd   :  { %52 = vst.msk [vmem:[#allocation2] sm:$0xff] %vm51_vm0, %v221_v0  ;;  %81 = vmatpush.msra.mxu0 %v59_v1  ;;  %130 = vmatpush.msra.mxu1 %v59_v1  ;;  %v56_v3 = vld [vmem:[#allocation3] sm:$0xff]  ;;  %vm60_vm1 = vcmask 130048   ;;  %v57_v4 = vld [vmem:[#allocation3 + $0x8] sm:$0xff]  ;;  %v138_v11 = vld [vmem:[%s272_s2] ss:$0 sm:$0xff] }
   0xe   :  { %53 = vst.msk [vmem:[#allocation2 + $0x8] sm:$0xff] %vm51_vm0, %v221_v0  ;;  %s222_s24 = smov [#allocation8]   ;;  %s114_s28 = sshll.u32 %s273_s3, 4  ;;  %s115_s28 = int_to_ptr.hbm [resolvable:$true] %s114_s28 }
   0xf   :  { %82 = vmatpush.msra.mxu0 %v58_v2  ;;  %131 = vmatpush.msra.mxu1 %v58_v2  ;;  %s112_s25 = sshll.u32 %s222_s24, 4  ;;  %s113_s25 = int_to_ptr.vmem [resolvable:$true] %s112_s25 }
  0x10   :  { %128 = vmatmul.msk.f32.vlgmr.msra.gmra.mxu0 %vm60_vm1, %v56_v3  ;;  %129 = vmatmul.msk.f32.vlgmr.msra.gmra.mxu1 %vm60_vm1, %v57_v4 }
  0x14   :  { %v54_v5 = vld [vmem:[#allocation2] sm:$0xff] }
  0x15   :  { %v55_v6 = vld [vmem:[#allocation2 + $0x8] sm:$0xff] }
  0x8d   :  { %v84_v7 = vpop.f32.mrf.mxu0  ;;  %v87_v8 = vpop.f32.mrf.mxu1 }
  0x8e   :  { %v90_v9 = vadd.f32 %v84_v7, %v54_v5  ;;  %v91_v10 = vadd.f32 %v87_v8, %v55_v6 }
  0x90   :  { %93 = vst.msk [vmem:[#allocation2] sm:$0xff] %vm51_vm0, %v90_v9 }
  0x91   :  { %94 = vst.msk [vmem:[#allocation2 + $0x8] sm:$0xff] %vm51_vm0, %v91_v10 }
  0x97   :  { %v98_v12 = vld [vmem:[#allocation2] sm:$0xff] }
  0x98   :  { %v99_v13 = vld [vmem:[#allocation2 + $0x8] sm:$0xff]  ;;  %v104_v14 = vadd.f32 %v138_v11, %v98_v12 }
  0x99   :  { %v105_v15 = vadd.f32 %v138_v11, %v99_v13 }
  0x9a   :  { %106 = vst.msk [vmem:[#allocation8] sm:$0xff] %vm51_vm0, %v104_v14 }
  0x9b   :  { %107 = vst.msk [vmem:[#allocation8 + $0x8] sm:$0xff] %vm51_vm0, %v105_v15 }
  0x9c   :  { %120 = dma.vmem_to_hbm [thread:$0]  %s113_s25, 256, %s115_s28, [#allocation5], %s218_s20, %s218_s20, %s219_s21  }
  0x9d   :  { %215 = dma.done.wait [#allocation5], 256  }
  0x9e   :  { %216 = vsyncadd [#allocation5], 4294967040 }
  0x9f   :  { %125 = vsyncpa [#allocation4], 1 }
  0xa0   :  { %126 = vsyncpa [#allocation7], 1 }
  0xa1   :  { %127 = vsyncpa [#allocation5], 1 }

</bundles_post_ra>
